<compile_context>
chip_gen: v5e
topology: v5e:2x2
jax: 0.10.0
libtpu: 0.0.40
codegen_flags: <defaults>
</compile_context>

<pallas_src>
import functools

import jax
import jax.numpy as jnp
from jax.experimental import pallas as pl
from jax.experimental.pallas import tpu as pltpu


def _round_up(x, m):
    return (x + m - 1) // m * m


def _vmem_cap_bytes():
    """~75% of this generation's physical VMEM (v5e/v6e: 128 MiB, v7x: 64 MiB/TC)."""
    try:
        cap = int(0.75 * pltpu.get_tpu_info().vmem_capacity_bytes)
    except Exception:
        cap = 48 << 20  # conservative fallback (fits v7x's 64 MiB per TC)
    return max(cap, 16 << 20)


def _patch_embed_kernel(patches_ref, w_ref, b_ref, o_ref):
    # patches_ref: (TM, Kp) compute_dtype; w_ref: (Kp, Ep) compute_dtype
    # b_ref: (1, Ep) f32; o_ref: (TM, Ep) out_dtype
    acc = jnp.dot(patches_ref[...], w_ref[...], preferred_element_type=jnp.float32)
    o_ref[...] = (acc + b_ref[...]).astype(o_ref.dtype)


def patch_embed(x, weight, bias, patch_size, flatten=True, *,
                tile_m=512, compute_dtype=jnp.bfloat16, out_dtype=None,
                allow_input_fusion=True):
    """x: (B, C, H, W); weight: (E, C, p, p); bias: (E,).

    Returns (B, N, E) if flatten else (B, E, H/p, W/p).  out_dtype defaults to
    compute_dtype (bf16) -> half the output HBM bytes; pass out_dtype=jnp.float32
    (and compute_dtype=jnp.float32) for PyTorch-parity numerics.
    """
    B, C, H, W = x.shape
    E = weight.shape[0]
    p = patch_size
    assert H % p == 0 and W % p == 0
    Hp, Wp = H // p, W // p
    N = Hp * Wp
    K = C * p * p
    M = B * N
    out_dtype = compute_dtype if out_dtype is None else out_dtype

    # ---- layout glue: im2col + compute-dtype cast (one fused XLA pass, zero FLOPs).
    # With allow_input_fusion XLA may pull this straight into the pallas_call input
    # DMA, removing the extra HBM round trip.
    patches = x.reshape(B, C, Hp, p, Wp, p).transpose(0, 2, 4, 1, 3, 5).reshape(M, K)
    patches = patches.astype(compute_dtype)

    # ---- tile sizing: lane-dense K/E (multiples of 128), sublane-dense M (mult. 16).
    Kp = _round_up(K, 128)
    Ep = _round_up(E, 128)

    tile_m = max(16, _round_up(int(tile_m), 16))     # sanitize user tile_m
    if tile_m >= 256:
        tile_m = _round_up(tile_m, 256)              # MXU-friendly on v6e/v7x
    TM = min(tile_m, _round_up(M, 16))
    Mp = _round_up(M, TM)
    # v7x has 2 TensorCores: make sure the "parallel" M axis has >= 2 steps when the
    # problem is big enough (neutral on single-TC v5e/v6e).
    if Mp // TM < 2 and Mp >= 512:
        TM = max(256, (Mp // 2) // 256 * 256)
        Mp = _round_up(M, TM)

    in_isz = jnp.dtype(compute_dtype).itemsize
    out_isz = jnp.dtype(out_dtype).itemsize

    def _vmem_need(tm):
        return (2 * tm * Kp * in_isz          # double-buffered patch tiles
                + 2 * tm * Ep * out_isz       # double-buffered output tiles
                + 2 * Kp * Ep * in_isz        # weight (pipeline allocates 2 buffers)
                + 2 * 8 * Ep * 4)             # bias (padded to 8 sublanes)

    cap = _vmem_cap_bytes()
    while _vmem_need(TM) + (4 << 20) > cap and TM > 16:
        TM = max(16, _round_up(TM // 2, 16))
        Mp = _round_up(M, TM)
    vmem_need = _vmem_need(TM)
    # Never set the limit below the actual need; leave headroom up to the gen cap.
    vmem_limit = int(min(cap, vmem_need + max(vmem_need // 2, 8 << 20)))

    # ---- pad operands to the tiled shapes.
    if (Mp, Kp) != (M, K):
        patches = jnp.pad(patches, ((0, Mp - M), (0, Kp - K)))
    w2 = weight.reshape(E, K).T.astype(compute_dtype)          # (K, E)
    if (Kp, Ep) != (K, E):
        w2 = jnp.pad(w2, ((0, Kp - K), (0, Ep - E)))
    b2 = bias.astype(jnp.float32).reshape(1, E)
    if Ep != E:
        b2 = jnp.pad(b2, ((0, 0), (0, Ep - E)))

    grid = (Mp // TM,)
    cost = pl.CostEstimate(
        flops=2 * Mp * Kp * Ep,
        transcendentals=0,
        bytes_accessed=(Mp * Kp * in_isz + Kp * Ep * in_isz
                        + Mp * Ep * out_isz + Ep * 4),
    )

    out = pl.pallas_call(
        _patch_embed_kernel,
        out_shape=jax.ShapeDtypeStruct((Mp, Ep), out_dtype),
        grid_spec=pltpu.PrefetchScalarGridSpec(
            num_scalar_prefetch=0,
            grid=grid,
            in_specs=[
                pl.BlockSpec((TM, Kp), lambda i: (i, 0)),   # patch-row tiles
                pl.BlockSpec((Kp, Ep), lambda i: (0, 0)),   # weight: VMEM-resident
                pl.BlockSpec((1, Ep), lambda i: (0, 0)),    # bias:   VMEM-resident
            ],
            out_specs=pl.BlockSpec((TM, Ep), lambda i: (i, 0)),
        ),
        compiler_params=pltpu.CompilerParams(
            dimension_semantics=("parallel",),
            vmem_limit_bytes=vmem_limit,
            # Let XLA fuse the im2col transpose/cast into the patches input.
            allow_input_fusion=[True, False, False] if allow_input_fusion else None,
        ),
        cost_estimate=cost,
    )(patches, w2, b2)

    # NOTE: for non-128-multiple E this slice is an extra XLA copy pass; standard ViT
    # embed dims (768/1024/...) hit the fast path where it is a no-op on E.
    out = out[:M, :E].reshape(B, N, E)
    # norm_layer=None in the module default -> nn.Identity(); nothing to do.
    if not flatten:
        out = out.reshape(B, Hp, Wp, E).transpose(0, 3, 1, 2)  # (B, E, H/p, W/p)
    return out


if __name__ == "__main__":
    # Small shapes consistent with the module: batch=2, in_chans=4, spatial=16x16,
    # patch_size=8, embed_dim=32  ->  N = (16/8)*(16/8) = 4 patches per image.
    B, C, H, W = 2, 4, 16, 16
    p, E = 8, 32

    key = jax.random.PRNGKey(0)
    kx, kw, kb = jax.random.split(key, 3)
    x = jax.random.normal(kx, (B, C, H, W), dtype=jnp.float32)
    weight = jax.random.normal(kw, (E, C, p, p), dtype=jnp.float32) * 0.02
    bias = jax.random.normal(kb, (E,), dtype=jnp.float32) * 0.02

    # Pure-JAX reference of the PyTorch forward (f32 accumulate).
    patches_ref = x.reshape(B, C, H // p, p, W // p, p)
    patches_ref = patches_ref.transpose(0, 2, 4, 1, 3, 5).reshape(B, -1, C * p * p)
    ref = jnp.einsum("bnk,ek->bne", patches_ref, weight.reshape(E, -1)) + bias
    ref = jax.block_until_ready(ref)

    # (1) Default fast path: bf16 MXU inputs, bf16 output (mem-bound regimes).
    out_fast = jax.block_until_ready(patch_embed(x, weight, bias, patch_size=p))
    assert out_fast.shape == (B, (H // p) * (W // p), E)
    assert out_fast.dtype == jnp.bfloat16
    assert jnp.allclose(out_fast.astype(jnp.float32), ref, atol=3e-2, rtol=3e-2)

    # (2) f32 parity path (compute + output in f32).
    out_f32 = jax.block_until_ready(
        patch_embed(x, weight, bias, patch_size=p,
                    compute_dtype=jnp.float32, out_dtype=jnp.float32))
    assert out_f32.dtype == jnp.float32
    assert jnp.allclose(out_f32, ref, atol=1e-2, rtol=1e-2)

    # (3) flatten=False path (conv feature-map layout).
    out_map = jax.block_until_ready(
        patch_embed(x, weight, bias, patch_size=p, flatten=False,
                    compute_dtype=jnp.float32, out_dtype=jnp.float32))
    assert out_map.shape == (B, E, H // p, W // p)
    assert jnp.allclose(out_map.transpose(0, 2, 3, 1).reshape(B, -1, E), ref,
                        atol=1e-2, rtol=1e-2)

    print("KERNEL_OK")
</pallas_src>

<mosaic_0001>
module attributes {stable_mosaic.version = 11 : i64} {
  func.func @_patch_embed_kernel(%arg0: i32, %arg1: memref<16x256xbf16, #tpu.memory_space<vmem>>, %arg2: memref<256x128xbf16, #tpu.memory_space<vmem>>, %arg3: memref<1x128xf32, #tpu.memory_space<vmem>>, %arg4: memref<16x128xbf16, #tpu.memory_space<vmem>>) attributes {dimension_semantics = [#tpu.dimension_semantics<parallel>], iteration_bounds = array<i64: 1>, scalar_prefetch = 0 : i64, scratch_operands = 0 : i64, tpu.core_type = #tpu.core_type<tc>, window_params = [{transform_indices = @transform_0, window_bounds = array<i64: 16, 256>}, {pipeline_mode = #tpu.pipeline_mode<synchronous>, transform_indices = @transform_1, window_bounds = array<i64: 256, 128>}, {pipeline_mode = #tpu.pipeline_mode<synchronous>, transform_indices = @transform_2, window_bounds = array<i64: 1, 128>}, {transform_indices = @transform_3, window_bounds = array<i64: 16, 128>}]} {
    %c0 = arith.constant 0 : index
    %c0_0 = arith.constant 0 : index
    %0 = vector.load %arg1[%c0, %c0_0] : memref<16x256xbf16, #tpu.memory_space<vmem>>, vector<16x256xbf16>
    %c0_1 = arith.constant 0 : index
    %c0_2 = arith.constant 0 : index
    %1 = vector.load %arg2[%c0_1, %c0_2] : memref<256x128xbf16, #tpu.memory_space<vmem>>, vector<256x128xbf16>
    %cst = arith.constant dense<0.000000e+00> : vector<16x128xf32>
    %2 = tpu.matmul %0, %1, %cst {dimension_numbers = #tpu.dot_dimension_numbers<[1], [0], [0], [1], [0, 0, 1, 1], [], []>} : vector<16x256xbf16>, vector<256x128xbf16>, vector<16x128xf32> -> vector<16x128xf32>
    %c0_3 = arith.constant 0 : index
    %c0_4 = arith.constant 0 : index
    %3 = vector.load %arg3[%c0_3, %c0_4] : memref<1x128xf32, #tpu.memory_space<vmem>>, vector<1x128xf32>
    %4 = vector.broadcast %3 : vector<1x128xf32> to vector<16x128xf32>
    %5 = arith.addf %2, %4 : vector<16x128xf32>
    %6 = arith.truncf %5 : vector<16x128xf32> to vector<16x128xbf16>
    %c0_5 = arith.constant 0 : index
    %c0_6 = arith.constant 0 : index
    %7 = vector.load %arg4[%c0_5, %c0_6] : memref<16x128xbf16, #tpu.memory_space<vmem>>, vector<16x128xbf16>
    tpu.vector_store %arg4[%c0_5, %c0_6], %6 {strides = array<i32>} : memref<16x128xbf16, #tpu.memory_space<vmem>>, vector<16x128xbf16>,
    return
  }
  func.func @transform_0(%arg0: i32) -> (i32, i32) {
    %c0_i32 = arith.constant 0 : i32
    %c0_i32_0 = arith.constant 0 : i32
    return %arg0, %c0_i32 : i32, i32
  }
  func.func @transform_1(%arg0: i32) -> (i32, i32) {
    %c0_i32 = arith.constant 0 : i32
    %c0_i32_0 = arith.constant 0 : i32
    %c0_i32_1 = arith.constant 0 : i32
    return %c0_i32, %c0_i32_0 : i32, i32
  }
  func.func @transform_2(%arg0: i32) -> (i32, i32) {
    %c0_i32 = arith.constant 0 : i32
    %c0_i32_0 = arith.constant 0 : i32
    %c0_i32_1 = arith.constant 0 : i32
    return %c0_i32, %c0_i32_0 : i32, i32
  }
  func.func @transform_3(%arg0: i32) -> (i32, i32) {
    %c0_i32 = arith.constant 0 : i32
    %c0_i32_0 = arith.constant 0 : i32
    return %arg0, %c0_i32 : i32, i32
  }
}

</mosaic_0001>

<bundles_post_ra>
// kernel: tpu_custom_call.1
= control target key start
LH: loop header
LB: loop body
LE: loop exit
PB: predicated region body
PF: predicated region fallthrough
CT: control target
= control target key end

     0   :  { %8 = vsyncpa [#allocation3], 0  ;;  %s469_s0 = inlined_call_operand.hbm [shape: bf16[16,256], index: 0, kind: input, shape index: {}]   ;;  %s470_s1 = inlined_call_operand.hbm [shape: bf16[256,128], index: 1, kind: input, shape index: {}]   ;;  %s471_s2 = inlined_call_operand.vmem [shape: f32[1,128], index: 2, kind: input, shape index: {}]   ;;  %s472_s3 = inlined_call_operand.hbm [shape: bf16[16,128], index: 3, kind: output, shape index: {}]  }
   0x1   :  { %9 = vsyncpa [#allocation6], 0 }
   0x2   :  { %10 = vsyncpa [#allocation4], 0  ;;  %s15_s14 = sshll.u32 %s469_s0, 4  ;;  %s424_s15 = smov [#allocation2]   ;;  %s16_s14 = int_to_ptr.hbm [resolvable:$true] %s15_s14 }
   0x3   :  { %s17_s16 = sshll.u32 %s424_s15, 4  ;;  %s28_s19 = sshll.u32 %s470_s1, 4  ;;  %s18_s16 = int_to_ptr.vmem [resolvable:$true] %s17_s16  ;;  %s29_s19 = int_to_ptr.hbm [resolvable:$true] %s28_s19 }
   0x4   :  { %s425_s20 = smov 128   ;;  %s426_s21 = smov 8  }
   0x5   :  { %23 = dma.hbm_to_vmem [thread:$0]  %s16_s14, 256, %s18_s16, [#allocation3], %s425_s20, %s425_s20, %s426_s21  }
   0x6   :  { %s427_s22 = smov [#allocation5]   ;;  %s428_s24 = smov 64  }
   0x7   :  { %s30_s23 = sshll.u32 %s427_s22, 4  ;;  %s429_s25 = smov 4   ;;  %s31_s23 = int_to_ptr.vmem [resolvable:$true] %s30_s23 }
   0x8   :  { %36 = dma.hbm_to_vmem [thread:$0]  %s29_s19, 2048, %s31_s23, [#allocation6], %s428_s24, %s428_s24, %s429_s25  }
   0x9   :  { %418 = dma.done.wait [#allocation3], 256  }
   0xa   :  { %419 = vsyncadd [#allocation3], 4294967040 }
   0xb   :  { %420 = dma.done.wait [#allocation6], 2048  }
   0xc   :  { %421 = vsyncadd [#allocation6], 4294965248  ;;  %v324_v0 = vld [vmem:[#allocation5 + $0x38] sm:$0xff]  ;;  %v323_v2 = vld [vmem:[#allocation5 + $0x30] sm:$0xff]  ;;  %s430_s26 = smov [#allocation7]   ;;  %s229_s30 = sshll.u32 %s472_s3, 4  ;;  %s230_s30 = int_to_ptr.hbm [resolvable:$true] %s229_s30 }
   0xd   :  { %v332_v1 = vld [vmem:[#allocation5 + $0x78] sm:$0xff]  ;;  %191 = vmatpush.bf16.msra.mxu0 %v324_v0  ;;  %v331_v3 = vld [vmem:[#allocation5 + $0x70] sm:$0xff]  ;;  %v322_v4 = vld [vmem:[#allocation5 + $0x28] sm:$0xff]  ;;  %s227_s27 = sshll.u32 %s430_s26, 4  ;;  %s228_s27 = int_to_ptr.vmem [resolvable:$true] %s227_s27 }
   0xe   :  { %205 = vmatpush.bf16.msra.mxu1 %v332_v1  ;;  %v330_v5 = vld [vmem:[#allocation5 + $0x68] sm:$0xff]  ;;  %v321_v6 = vld [vmem:[#allocation5 + $0x20] sm:$0xff]  ;;  %v320_v8 = vld [vmem:[#allocation5 + $0x18] sm:$0xff] }
   0xf   :  { %v329_v7 = vld [vmem:[#allocation5 + $0x60] sm:$0xff]  ;;  %v328_v9 = vld [vmem:[#allocation5 + $0x58] sm:$0xff]  ;;  %v319_v10 = vld [vmem:[#allocation5 + $0x10] sm:$0xff] }
  0x10   :  { %v327_v11 = vld [vmem:[#allocation5 + $0x50] sm:$0xff]  ;;  %v318_v12 = vld [vmem:[#allocation5 + $0x8] sm:$0xff]  ;;  %v317_v14 = vld [vmem:[#allocation5] sm:$0xff] }
  0x11   :  { %192 = vmatpush.bf16.msra.mxu0 %v323_v2  ;;  %v326_v13 = vld [vmem:[#allocation5 + $0x48] sm:$0xff]  ;;  %v325_v15 = vld [vmem:[#allocation5 + $0x40] sm:$0xff]  ;;  %v245_v16 = vld [vmem:[#allocation2] sm:$0xf] }
  0x12   :  { %206 = vmatpush.bf16.msra.mxu1 %v331_v3  ;;  %v316_v17 = vld [vmem:[#allocation2 + $0x4] sm:$0xf0]  ;;  %v315_v18 = vld [vmem:[#allocation2 + $0x4] sm:$0xf]  ;;  %v247_v19 = vld [vmem:[#allocation2 + $0x8] sm:$0xf0] }
  0x13   :  { %v246_v20 = vor.u32 %v316_v17, %v245_v16  ;;  %v250_v21 = vor.u32 %v315_v18, %v247_v19  ;;  %v345_v24 = vld [vmem:[%s471_s2] ss:$0 sm:$0xff] }
  0x15   :  { %193 = vmatpush.bf16.msra.mxu0 %v322_v4 }
  0x16   :  { %207 = vmatpush.bf16.msra.mxu1 %v330_v5 }
  0x19   :  { %194 = vmatpush.bf16.msra.mxu0 %v321_v6 }
  0x1a   :  { %208 = vmatpush.bf16.msra.mxu1 %v329_v7 }
  0x1d   :  { %195 = vmatpush.bf16.msra.mxu0 %v320_v8 }
  0x1e   :  { %209 = vmatpush.bf16.msra.mxu1 %v328_v9 }
  0x21   :  { %196 = vmatpush.bf16.msra.mxu0 %v319_v10 }
  0x22   :  { %210 = vmatpush.bf16.msra.mxu1 %v327_v11 }
  0x25   :  { %197 = vmatpush.bf16.msra.mxu0 %v318_v12 }
  0x26   :  { %211 = vmatpush.bf16.msra.mxu1 %v326_v13 }
  0x29   :  { %198 = vmatpush.bf16.msra.mxu0 %v317_v14 }
  0x2a   :  { %212 = vmatpush.bf16.msra.mxu1 %v325_v15 }
  0x2c   :  { %199 = vmatmul.bf16.vlgmr.msra.gmra.mxu0 %v246_v20 }
  0x2d   :  { %213 = vmatmul.bf16.vlgmr.msra.gmra.mxu1 %v250_v21 }
  0xa9   :  { %v200_v22 = vpop.f32.mrf.mxu0 }
  0xaa   :  { %v214_v23 = vpop.f32.mrf.mxu1  ;;  %v201_v25 = vadd.f32 %v345_v24, %v200_v22 }
  0xac   :  { %v215_v29 = vadd.f32 %v214_v23, %v201_v25 }
  0xb1   :  { %v202_v26 = vpop.f32.mrf.mxu0 }
  0xb2   :  { %v203_v27 = vadd.f32 %v345_v24, %v202_v26  ;;  %v216_v28 = vpop.f32.mrf.mxu1 }
  0xb4   :  { %v217_v30 = vadd.f32 %v216_v28, %v203_v27 }
  0xb6   :  { %v336_v31 = vpack.c.bf16 %v217_v30, %v215_v29 }
  0xb8   :  { %337 = vst [vmem:[#allocation7] sm:$0xff] %v336_v31  }
  0xb9   :  { %235 = dma.vmem_to_hbm [thread:$0]  %s228_s27, 128, %s230_s30, [#allocation4], %s428_s24, %s428_s24, %s429_s25  }
  0xba   :  { %422 = dma.done.wait [#allocation4], 128  }
  0xbb   :  { %423 = vsyncadd [#allocation4], 4294967168 }
  0xbc   :  { %240 = vsyncpa [#allocation3], 1 }
  0xbd   :  { %241 = vsyncpa [#allocation6], 1 }
  0xbe   :  { %242 = vsyncpa [#allocation4], 1 }

</bundles_post_ra>
